<compile_context>
chip_gen: v7x
topology: tpu7x:2x2x1
jax: 0.10.0
libtpu: 0.0.40
codegen_flags: <defaults>
</compile_context>

<pallas_src>
import functools

import jax
import jax.numpy as jnp
from jax.experimental import pallas as pl
from jax.experimental.pallas import tpu as pltpu


def _fuse_kernel(gw_ref, msel_ref, x_ref, o_ref):
    """Box-filter conv for one batch element, emitted in flatten(-3,-1) order.

    gw_ref:   (W, P)    scaled horizontal-window selection matrix (constant)
    msel_ref: (H, P)    vertical-window selection mask (constant)
    x_ref:    (Cin, H, W)  input image (NCHW layout, W on lanes)
    o_ref:    (1, P)    flattened output row, P = Cout*Ho*Wo (torch order)
    """
    # (1) Sum over input channels — Cin-1 VPU vreg adds.
    s = jnp.sum(x_ref[...].astype(jnp.float32), axis=0)              # (H, W)

    # (2) Horizontal (W) tap + stride sum as ONE matmul against the banded,
    #     pre-scaled 0/(1/ksz^2) selection matrix.  Lane index p is already in
    #     torch flatten(-3,-1) order, so no lane shuffles are needed later.
    tmp = jnp.dot(s, gw_ref[...], preferred_element_type=jnp.float32)  # (H, P)

    # (3) Vertical (H) tap + stride sum: per-lane sublane mask, then a sublane
    #     reduction (XLU) — keeps everything lane-dense, no gathers.
    flat = jnp.sum(msel_ref[...] * tmp, axis=0, keepdims=True)        # (1, P)

    o_ref[...] = flat.astype(o_ref.dtype)


class FuseLayerPallas:
    """JAX/Pallas re-implementation of the PyTorch FuseLayer (imgDims == 2)."""

    def __init__(self, lenFcn, imgDims, ksz, stride):
        assert imgDims == 2, "only the 2-D (Conv2d) path is implemented"
        self.ksz = ksz
        self.stride = stride
        self.pad = 0
        self.imgDims = imgDims
        self.cin = (lenFcn * 2 + 1) * imgDims
        self.cout = imgDims
        self.scale = 1.0 / float(ksz ** imgDims)
        # Frozen module parameters, kept only for the XLA reference check; the
        # kernel bakes them in (uniform 1/ksz**2 weights, zero bias).
        self.weight = jnp.full((self.cout, self.cin, ksz, ksz), self.scale,
                               jnp.float32)                      # OIHW
        self.bias = jnp.zeros((self.cout,), jnp.float32)

    def calc_conv(self, isz):
        return int((isz + 2 * self.pad - (self.ksz - 1) - 1) / self.stride + 1)

    def _selection_matrices(self, H, W, Ho, Wo):
        """Constant banded selection matrices in flatten(-3,-1) lane order."""
        P = self.cout * Ho * Wo
        p = jnp.arange(P, dtype=jnp.int32)
        p_hw = p % (Ho * Wo)
        col = p_hw % Wo                       # output column j per lane
        row = p_hw // Wo                      # output row    i per lane

        w = jnp.arange(W, dtype=jnp.int32)[:, None]
        dw = w - col[None, :] * self.stride
        gw = jnp.where((dw >= 0) & (dw < self.ksz), self.scale, 0.0)
        gw = gw.astype(jnp.float32)           # (W, P), scale folded in

        h = jnp.arange(H, dtype=jnp.int32)[:, None]
        dh = h - row[None, :] * self.stride
        msel = jnp.where((dh >= 0) & (dh < self.ksz), 1.0, 0.0)
        msel = msel.astype(jnp.float32)       # (H, P)
        return gw, msel, P

    def __call__(self, x_nchw):
        N, C, H, W = x_nchw.shape
        assert C == self.cin
        Ho, Wo = self.calc_conv(H), self.calc_conv(W)
        gw, msel, P = self._selection_matrices(H, W, Ho, Wo)

        out = pl.pallas_call(
            _fuse_kernel,
            out_shape=jax.ShapeDtypeStruct((N, 1, P), x_nchw.dtype),
            grid=(N,),
            in_specs=[
                # Constant selection matrices: block index never changes, so
                # the pipeline fetches them once and keeps them resident.
                pl.BlockSpec((W, P), lambda n: (0, 0)),
                pl.BlockSpec((H, P), lambda n: (0, 0)),
                # One whole image per grid step (NCHW, W on lanes).
                pl.BlockSpec((None, C, H, W), lambda n: (n, 0, 0, 0)),
            ],
            out_specs=pl.BlockSpec((None, 1, P), lambda n: (n, 0, 0)),
            compiler_params=pltpu.CompilerParams(
                dimension_semantics=("parallel",)),
        )(gw, msel, x_nchw)

        # Already in torch flatten(-3,-1) memory order: metadata-only reshape.
        out = out.reshape(N, P)
        if out.shape[1] == 1:                 # replicate .squeeze(1) semantics
            out = jnp.squeeze(out, 1)
        return out


if __name__ == "__main__":
    lenFcn, imgDims, ksz, stride = 1, 2, 3, 2
    N, H, W = 2, 17, 17                        # Ho = Wo = 8 -> P = 128 (lane-dense)
    Cin = (lenFcn * 2 + 1) * imgDims           # 6

    key = jax.random.PRNGKey(0)
    x = jax.random.normal(key, (N, Cin, H, W), dtype=jnp.float32)

    layer = FuseLayerPallas(lenFcn, imgDims, ksz, stride)
    out = jax.block_until_ready(layer(x))

    # Reference (plain XLA conv) for a correctness check.
    ref = jax.lax.conv_general_dilated(
        x, layer.weight, window_strides=(stride, stride), padding="VALID",
        dimension_numbers=("NCHW", "OIHW", "NCHW"))
    ref = ref + layer.bias[None, :, None, None]
    ref = ref.reshape(N, -1)

    assert out.shape == ref.shape, (out.shape, ref.shape)
    assert jnp.allclose(out, ref, atol=1e-4, rtol=1e-4), "mismatch vs XLA reference"
    print("KERNEL_OK")
</pallas_src>

<mosaic_0001>
module attributes {stable_mosaic.version = 11 : i64} {
  func.func @_fuse_kernel(%arg0: i32, %arg1: memref<17x128xf32, #tpu.memory_space<vmem>>, %arg2: memref<17x128xf32, #tpu.memory_space<vmem>>, %arg3: memref<1x6x17x17xf32, #tpu.memory_space<vmem>>, %arg4: memref<1x1x128xf32, #tpu.memory_space<vmem>>) attributes {dimension_semantics = [#tpu.dimension_semantics<parallel>], iteration_bounds = array<i64: 2>, scalar_prefetch = 0 : i64, scratch_operands = 0 : i64, tpu.core_type = #tpu.core_type<tc>, window_params = [{pipeline_mode = #tpu.pipeline_mode<synchronous>, transform_indices = @transform_0, window_bounds = array<i64: 17, 128>}, {pipeline_mode = #tpu.pipeline_mode<synchronous>, transform_indices = @transform_1, window_bounds = array<i64: 17, 128>}, {transform_indices = @transform_2, window_bounds = array<i64: 1, 6, 17, 17>}, {transform_indices = @transform_3, window_bounds = array<i64: 1, 1, 128>}]} {
    %c0 = arith.constant 0 : index
    %c0_0 = arith.constant 0 : index
    %c0_1 = arith.constant 0 : index
    %c0_2 = arith.constant 0 : index
    %0 = vector.load %arg3[%c0, %c0_0, %c0_1, %c0_2] : memref<1x6x17x17xf32, #tpu.memory_space<vmem>>, vector<1x6x17x17xf32>
    %1 = vector.shape_cast %0 : vector<1x6x17x17xf32> to vector<6x17x17xf32>
    %cst = arith.constant dense<0.000000e+00> : vector<17x17xf32>
    %2 = vector.multi_reduction <add>, %1, %cst [0] : vector<6x17x17xf32> to vector<17x17xf32>
    %c0_3 = arith.constant 0 : index
    %c0_4 = arith.constant 0 : index
    %3 = vector.load %arg1[%c0_3, %c0_4] : memref<17x128xf32, #tpu.memory_space<vmem>>, vector<17x128xf32>
    %cst_5 = arith.constant dense<0.000000e+00> : vector<17x128xf32>
    %4 = tpu.matmul %2, %3, %cst_5 {dimension_numbers = #tpu.dot_dimension_numbers<[1], [0], [0], [1], [0, 0, 1, 1], [], []>} : vector<17x17xf32>, vector<17x128xf32>, vector<17x128xf32> -> vector<17x128xf32>
    %c0_6 = arith.constant 0 : index
    %c0_7 = arith.constant 0 : index
    %5 = vector.load %arg2[%c0_6, %c0_7] : memref<17x128xf32, #tpu.memory_space<vmem>>, vector<17x128xf32>
    %6 = arith.mulf %5, %4 : vector<17x128xf32>
    %cst_8 = arith.constant dense<0.000000e+00> : vector<128xf32>
    %7 = vector.multi_reduction <add>, %6, %cst_8 [0] : vector<17x128xf32> to vector<128xf32>
    %8 = vector.shape_cast %7 : vector<128xf32> to vector<1x128xf32>
    %c0_9 = arith.constant 0 : index
    %c0_10 = arith.constant 0 : index
    %c0_11 = arith.constant 0 : index
    %9 = vector.load %arg4[%c0_9, %c0_10, %c0_11] : memref<1x1x128xf32, #tpu.memory_space<vmem>>, vector<1x1x128xf32>
    %10 = vector.shape_cast %9 : vector<1x1x128xf32> to vector<1x128xf32>
    %11 = vector.shape_cast %8 : vector<1x128xf32> to vector<1x1x128xf32>
    tpu.vector_store %arg4[%c0_9, %c0_10, %c0_11], %11 {strides = array<i32>} : memref<1x1x128xf32, #tpu.memory_space<vmem>>, vector<1x1x128xf32>,
    return
  }
  func.func @transform_0(%arg0: i32) -> (i32, i32) {
    %c0_i32 = arith.constant 0 : i32
    %c0_i32_0 = arith.constant 0 : i32
    %c0_i32_1 = arith.constant 0 : i32
    return %c0_i32, %c0_i32_0 : i32, i32
  }
  func.func @transform_1(%arg0: i32) -> (i32, i32) {
    %c0_i32 = arith.constant 0 : i32
    %c0_i32_0 = arith.constant 0 : i32
    %c0_i32_1 = arith.constant 0 : i32
    return %c0_i32, %c0_i32_0 : i32, i32
  }
  func.func @transform_2(%arg0: i32) -> (i32, i32, i32, i32) {
    %c0_i32 = arith.constant 0 : i32
    %c0_i32_0 = arith.constant 0 : i32
    %c0_i32_1 = arith.constant 0 : i32
    %c0_i32_2 = arith.constant 0 : i32
    return %arg0, %c0_i32, %c0_i32_0, %c0_i32_1 : i32, i32, i32, i32
  }
  func.func @transform_3(%arg0: i32) -> (i32, i32, i32) {
    %c0_i32 = arith.constant 0 : i32
    %c0_i32_0 = arith.constant 0 : i32
    %c0_i32_1 = arith.constant 0 : i32
    return %arg0, %c0_i32, %c0_i32_0 : i32, i32, i32
  }
}

</mosaic_0001>

<bundles_post_ra>
// kernel: tpu_custom_call.1
= control target key start
LH: loop header
LB: loop body
LE: loop exit
PB: predicated region body
PF: predicated region fallthrough
CT: control target
= control target key end

     0   :  { %8 = vsyncpa [#allocation3], 0  ;;  %s742_s0 = inlined_call_operand.vmem [shape: f32[17,128], index: 0, kind: input, shape index: {}]   ;;  %s743_s1 = inlined_call_operand.vmem [shape: f32[17,128], index: 1, kind: input, shape index: {}]   ;;  %s744_s2 = inlined_call_operand.vmem [shape: f32[2,6,17,17], index: 2, kind: input, shape index: {}]   ;;  %s745_s3 = inlined_call_operand.hbm [shape: f32[2,1,128], index: 3, kind: output, shape index: {}]  }
   0x1   :  { %10 = vsyncpa [#allocation3 + $0x1], 0  ;;  %s572_s12 = smov 0   ;;  %s574_s13 = smov 0  }
   0x2   :  { %s576_s14 = smov 0   ;;  %s578_s15 = smov 0  }
   0x3 LB: > { %s593_s16 = sadd.s32 4294967295, %s546_s15   ;;  %s401_s17 = sadd.s32 4294967294, %s546_s15   ;;  %s546_s15 = sphi %s578_s15, %s751_s15   ;;  %s542_s14 = sphi %s576_s14, %s750_s14   ;;  %s538_s13 = sphi %s574_s13, %s749_s13   ;;  %s534_s12 = sphi %s572_s12, %s748_s12  }
   0x4   : > { %s597_s18 = sadd.s32 1, %s546_s15   ;;  %s91_s19 = sadd.s32 1, %s542_s14 }
   0x5   : > { %s88_s20 = ssub.s32 %s546_s15, %s597_s18  ;;  %p101_p0 = scmp.ne.s32.totalorder %s542_s14, %s538_s13 }
   0x6   : > { %p89_p1 = scmp.eq.s32.totalorder %s88_s20, 0  ;;  %p102_p2 = scmp.eq.s32.totalorder %s593_s16, 1 }
   0x7   : > { %p107_p3 = scmp.ne.s32.totalorder %s538_s13, %s534_s12  ;;  %p108_p4 = scmp.eq.s32.totalorder %s401_s17, 1 }
   0x8   : > { %s608_s21 = scalar_select %p89_p1, %s542_s14, %s91_s19  }
   0x9   : > { %p610_p5 = por %p102_p2, %p101_p0  ;;  %p614_p6 = por %p108_p4, %p107_p3 }
   0xa   : > { %p404_p7 = scmp.ge.s32.totalorder %s546_s15, 1  ;;  %p140_p8 = scmp.lt.s32.totalorder %s546_s15, 3 }
   0xc   : > { %p141_p9 = pnand %p404_p7, %p140_p8 }
   0xd   : > { %v221_v0 = vld [vmem:[%s742_s0] sm:$0xff] (!%p141_p9)  ;;  %v222_v1 = vld [vmem:[%s742_s0 + $0x8] sm:$0xff] (!%p141_p9)  ;;  %v548_v2 = vmov (!%p141_p9), 0.0|0.0   ;;  %p163_p10 = scmp.lt.s32.totalorder (!%p141_p9), %s593_s16, 1  ;;  %vm549_vm0 = vmmov (!%p141_p9), 0   ;;  %v550_v4 = vmov (!%p141_p9), 0.0  }
   0xe   : > { %144 = sbr.rel (%p141_p9) target bundleno = 287 (0x11f), region = 32  ;;  %434 = vmatprep.subr.bf16.mxu0 (!%p141_p9), %v548_v2  ;;  %437 = vmatprep.subr.bf16.mxu1 (!%p141_p9), %v548_v2  ;;  %v435_v3 = vpack.c.bf16 (!%p141_p9), %v222_v1, %v221_v0  ;;  %v223_v5 = vld [vmem:[%s742_s0 + $0x10] sm:$0x1] (!%p141_p9)  ;;  %vm233_vm1 = vcmask (!%p141_p9), 1040384   ;;  %vm186_vm2 = vcmask (!%p141_p9), 138240   ;;  %vm209_vm3 = vcmask (!%p141_p9), 131072  }
   0xf   : > { %425 = vmatprep.mubr.msk.f32.mxu0 (!%p141_p9), %vm549_vm0, %v550_v4  ;;  %428 = vmatprep.mubr.msk.f32.mxu1 (!%p141_p9), %vm549_vm0, %v550_v4  ;;  %v317_v57 = vld [vmem:[%s743_s1] sm:$0xff] (!%p141_p9)  ;;  %v318_v59 = vld [vmem:[%s743_s1 + $0x8] sm:$0xff] (!%p141_p9)  ;;  %v319_v1 = vld [vmem:[%s743_s1 + $0x10] sm:$0x1] (!%p141_p9)  ;;  %s161_s20 = sand.u32 (!%p141_p9), 1, %s538_s13   ;;  %s410_s24 = sshll.u32 (!%p141_p9), %s593_s16, 4 }
  0x10   : > { %436 = vmatpush3.bf16.msra.mxu0 (!%p141_p9), %v435_v3  ;;  %439 = vmatpush3.bf16.msra.mxu1 (!%p141_p9), %v435_v3  ;;  %s162_s25 = scalar_lea.vmem (!%p141_p9), [#allocation2], %s161_s20  ;;  %s700_s29 = scalar_lea.hbm (!%p141_p9), %s745_s3, %s410_s24 }
  0x11   : > { %423 = vmatprep.subr.mxu0 (!%p141_p9), %v550_v4  ;;  %438 = vmatprep.subr.mxu1 (!%p141_p9), %v550_v4  ;;  %s346_s26 = sshll.u32 (!%p141_p9), %s162_s25, 4  ;;  %s334_s30 = scalar_lea.sflag (!%p141_p9), [#allocation3], %s161_s20  ;;  %s702_s26 = int_to_ptr.vmem [resolvable:$true] %s346_s26 }
  0x14   : > { %424 = vmatpush3.msk.msra.mxu0 (!%p141_p9), %vm233_vm1, %v223_v5  ;;  %440 = vmatpush3.msk.msra.mxu1 (!%p141_p9), %vm233_vm1, %v223_v5 }
  0x15   : > { %s164_s28 = scalar_select %p163_p10, %s593_s16, 1 }
  0x16   : > { %s551_s16 = smov [#allocation2]  }
  0x17   : > { %s441_s4 = smul.u32 144, %s164_s28  ;;  %s488_s5 = sshll.u32 %s551_s16, 4  ;;  %s489_s5 = int_to_ptr.vmem [resolvable:$false] %s488_s5 }
  0x18   : > { %s490_s6 = scalar_lea.vmem %s489_s5, 32  ;;  %p491_p0 = scmp.lt.s32.totalorder %s702_s26, %s489_s5 }
  0x19   : > { %s642_s7 = scalar_lea.vmem %s744_s2, %s441_s4  ;;  %s484_s4 = scalar_lea.vmem %s702_s26, 16 }
  0x1a   : > { %v168_v6 = vld [vmem:[%s642_s7] sm:$0xff]  ;;  %v171_v7 = vld [vmem:[%s642_s7 + $0x18] sm:$0xff]  ;;  %v174_v8 = vld [vmem:[%s642_s7 + $0x30] sm:$0xff]  ;;  %p485_p11 = scmp.ne.s32.totalorder %s702_s26, %s484_s4  ;;  %p492_p1 = scmp.lt.s32.totalorder %s490_s6, %s484_s4 }
  0x1b   : > { %v177_v9 = vld [vmem:[%s642_s7 + $0x48] sm:$0xff]  ;;  %v180_v10 = vld [vmem:[%s642_s7 + $0x60] sm:$0xff]  ;;  %v187_v11 = vsel %vm186_vm2, %v168_v6, 0.0  ;;  %v188_v12 = vsel %vm186_vm2, %v171_v7, 0.0  ;;  %v190_v13 = vsel %vm186_vm2, %v174_v8, 0.0  ;;  %v175_v17 = vld [vmem:[%s642_s7 + $0x38] sm:$0xff] }
  0x1c   : > { %v189_v14 = vadd.f32 %v188_v12, %v187_v11  ;;  %v169_v15 = vld [vmem:[%s642_s7 + $0x8] sm:$0xff]  ;;  %v172_v16 = vld [vmem:[%s642_s7 + $0x20] sm:$0xff]  ;;  %v183_v18 = vld [vmem:[%s642_s7 + $0x78] sm:$0xff]  ;;  %v192_v19 = vsel %vm186_vm2, %v177_v9, 0.0  ;;  %v201_v23 = vsel %vm186_vm2, %v175_v17, 0.0  ;;  %v194_v25 = vsel %vm186_vm2, %v180_v10, 0.0  ;;  %p486_p12 = pnand %p485_p11, %p610_p5  ;;  %p493_p2 = por %p492_p1, %p491_p0 }
  0x1d   : > { %v178_v20 = vld [vmem:[%s642_s7 + $0x50] sm:$0xff]  ;;  %v198_v21 = vsel %vm186_vm2, %v169_v15, 0.0  ;;  %v199_v22 = vsel %vm186_vm2, %v172_v16, 0.0  ;;  %v181_v26 = vld [vmem:[%s642_s7 + $0x68] sm:$0xff]  ;;  %v176_v31 = vld [vmem:[%s642_s7 + $0x40] sm:$0x1] }
  0x1e   : > { %v191_v24 = vadd.f32 %v190_v13, %v189_v14  ;;  %v200_v27 = vadd.f32 %v199_v22, %v198_v21  ;;  %v170_v28 = vld [vmem:[%s642_s7 + $0x10] sm:$0x1]  ;;  %v173_v29 = vld [vmem:[%s642_s7 + $0x28] sm:$0x1]  ;;  %v203_v30 = vsel %vm186_vm2, %v178_v20, 0.0  ;;  %v184_v35 = vld [vmem:[%s642_s7 + $0x80] sm:$0xff]  ;;  %p487_p13 = pneg %p486_p12 }
  0x1f   : > { %v179_v32 = vld [vmem:[%s642_s7 + $0x58] sm:$0x1]  ;;  %v210_v33 = vsel %vm209_vm3, %v170_v28, 0.0  ;;  %v211_v37 = vsel %vm209_vm3, %v173_v29, 0.0  ;;  %v213_v38 = vsel %vm209_vm3, %v176_v31, 0.0  ;;  %v196_v39 = vsel %vm186_vm2, %v183_v18, 0.0 }
  0x20   : > { %v193_v34 = vadd.f32 %v192_v19, %v191_v24  ;;  %v202_v36 = vadd.f32 %v201_v23, %v200_v27  ;;  %v205_v40 = vsel %vm186_vm2, %v181_v26, 0.0  ;;  %v182_v41 = vld [vmem:[%s642_s7 + $0x70] sm:$0x1]  ;;  %v212_v42 = vadd.f32 %v211_v37, %v210_v33  ;;  %v185_v47 = vld [vmem:[%s642_s7 + $0x88] sm:$0x1]  ;;  %p494_p3 = pnand %p493_p2, %p487_p13 }
  0x21   : > { %v215_v45 = vsel %vm209_vm3, %v179_v32, 0.0  ;;  %v207_v46 = vsel %vm186_vm2, %v184_v35, 0.0  ;;  %v217_v51 = vsel %vm209_vm3, %v182_v41, 0.0  ;;  %v219_v54 = vsel %vm209_vm3, %v185_v47, 0.0 }
  0x22   : > { %v195_v43 = vadd.f32 %v194_v25, %v193_v34  ;;  %v204_v44 = vadd.f32 %v203_v30, %v202_v36  ;;  %v214_v48 = vadd.f32 %v213_v38, %v212_v42 }
  0x24   : > { %v197_v49 = vadd.f32 %v196_v39, %v195_v43  ;;  %v206_v50 = vadd.f32 %v205_v40, %v204_v44  ;;  %v216_v52 = vadd.f32 %v215_v45, %v214_v48 }
  0x26   : > { %426 = vmatmul.mubr.msk.f32.vlgmr.msra.gmra.mrb[0].mxu0 %vm186_vm2, %v197_v49  ;;  %v208_v53 = vadd.f32 %v207_v46, %v206_v50  ;;  %v218_v55 = vadd.f32 %v217_v51, %v216_v52 }
  0x28   : > { %429 = vmatmul.mubr.msk.f32.vlgmr.msra.gmra.mrb[0].mxu1 %vm186_vm2, %v208_v53  ;;  %v220_v56 = vadd.f32 %v219_v54, %v218_v55 }
  0x29   : > { %431 = vmatprep.mubr.msk.f32.mxu1 %vm549_vm0, %v550_v4 }
  0x2c   : > { %432 = vmatmul.mubr.msk.f32.gmra.mrb[2].mxu1 %vm186_vm2, %v220_v56 }
  0xf9   : > { %v303_v58 = vpop.f32.mrb[0].mxu0 }
  0xfa   : > { %v320_v60 = vmul.f32 %v317_v57, %v303_v58  ;;  %v427_v61 = vpop.f32.mrb[1].mxu0 }
  0xfb   : > { %v308_v62 = vpop.f32.mrb[0].mxu1 }
  0xfc   : > { %v321_v63 = vmul.f32 %v318_v59, %v308_v62  ;;  %v430_v0 = vpop.f32.mrb[1].mxu1 }
  0xfe   : > { %v323_v2 = vadd.f32 %v321_v63, %v320_v60 }
  0xff   : > { %v313_v3 = vpop.f32.mrb[2].mxu1 }
 0x100   : > { %v322_v4 = vmul.f32 %v319_v1, %v313_v3  ;;  %v433_v5 = vpop.f32.mrb[3].mxu1 }
 0x102   : > { %v324_v6 = vsel %vm233_vm1, %v322_v4, 0.0 }
 0x103   : > { %v325_v7 = vadd.f32 %v324_v6, %v323_v2 }
 0x105   : > { %v326_v8 = vrot.slane %v325_v7, 4 }
 0x107   : > { %v327_v9 = vadd.f32 %v326_v8, %v325_v7 }
 0x109   : > { %v328_v10 = vrot.slane %v327_v9, 2 }
 0x10b   : > { %v329_v11 = vadd.f32 %v328_v10, %v327_v9 }
 0x10d   : > { %v330_v12 = vrot.slane %v329_v11, 1 }
 0x10f   : > { %v331_v13 = vadd.f32 %v330_v12, %v329_v11 }
 0x111   : > { %332 = vst [vmem:[%s162_s25] sm:$0x1] %v331_v13 }
 0x112   : > { %497 = shalt.err (!%p494_p3)
}
 0x113   : > { %s498_s7 = scalar_lea.hbm %s700_s29, 16  ;;  %s502_s10 = scalar_lea.hbm %s745_s3, 32 }
 0x114   : > { %p499_p4 = scmp.ne.s32.totalorder %s700_s29, %s498_s7  ;;  %p503_p9 = scmp.lt.u32.totalorder %s700_s29, %s745_s3 }
 0x115   : > { %p504_p10 = scmp.lt.u32.totalorder %s502_s10, %s498_s7  ;;  %p506_p12 = scmp.lt.u32.totalorder %s498_s7, %s700_s29 }
 0x116   : > { %p500_p7 = pnand %p499_p4, %p610_p5 }
 0x117   : > { %p505_p11 = por %p504_p10, %p503_p9 }
 0x118   : > { %p501_p8 = pneg %p500_p7 }
 0x119   : > { %p507_p13 = por %p506_p12, %p505_p11 }
 0x11b   : > { %p508_p0 = pnand %p507_p13, %p501_p8 }
 0x11d   : > { %511 = shalt.err (!%p508_p0)
}
 0x11e   : > { %442 = dma.vmem_to_hbm [thread:$0]  (%p610_p5), %s702_s26, 16, %s700_s29, %s334_s30  }
 0x11f PF: > { %p448_p1 = scmp.ge.s32.totalorder %s546_s15, 2  ;;  %s358_s19 = sand.u32 1, %s534_s12  }
 0x120   : > { %s359_s20 = scalar_lea.sflag [#allocation3], %s358_s19 }
 0x121   : > { %p445_p2 = pnand %p448_p1, %p614_p6 }
 0x123   : > { %529 = dma.done.wait (!%p445_p2), %s359_s20, 16  }
 0x124   : > { %531 = vsyncadd (!%p445_p2), %s359_s20, 4294967280  ;;  %p13_p3 = scmp.ge.s32.totalorder %s597_s18, 4   ;;  %s748_s12 = smov %s538_s13 }
 0x125   : > { %s749_s13 = smov %s542_s14  ;;  %s750_s14 = smov %s608_s21 }
 0x126   : > { %s751_s15 = smov %s597_s18  ;;  %15 = sbr.rel (!%p13_p3) target bundleno = 3 (0x3), region = 67 }
 0x12d   :  { %363 = vsyncpa [#allocation3], 1 }
 0x12e   :  { %365 = vsyncpa [#allocation3 + $0x1], 1 }

</bundles_post_ra>
